<compile_context>
chip_gen: v6e
topology: v6e:2x2x1
jax: 0.10.0
libtpu: 0.0.40
codegen_flags: <defaults>
</compile_context>

<pallas_src>
import math
from functools import partial

import jax
import jax.numpy as jnp
from jax.experimental import pallas as pl
from jax.experimental.pallas import tpu as pltpu

_LANES = 128


def _linear2_kernel(x_ref, w_ref, b_ref, o_ref):
    """One (block_rows, 128) tile of the interleaved Linear(2, 2).

    Flat layout: lane 2j holds x[m, 0], lane 2j+1 holds x[m, 1]; the output
    uses the identical interleaving.

        y[m, 0] = w00*x[m,0] + w01*x[m,1] + b0     (even lanes)
        y[m, 1] = w10*x[m,0] + w11*x[m,1] + b1     (odd  lanes)

    Implemented as three lane-masked broadcast FMAs (VPU) plus two static lane
    rotations (XLU slot -> free in this HBM-bound kernel).  No MXU.
    """
    lane = jax.lax.broadcasted_iota(jnp.int32, (1, _LANES), 1)
    even = (lane & 1) == 0                       # (1, 128) lane-parity mask

    # 4 weight + 2 bias scalars, read once per tile from SMEM.
    w00 = w_ref[0, 0]
    w01 = w_ref[0, 1]
    w10 = w_ref[1, 0]
    w11 = w_ref[1, 1]
    b0 = b_ref[0]
    b1 = b_ref[1]

    zero = jnp.zeros((), dtype=w_ref.dtype)
    w_self = jnp.where(even, w00, w11)           # weight for this lane's value
    w_next = jnp.where(even, w01, zero)          # weight for neighbour lane l+1
    w_prev = jnp.where(even, zero, w10)          # weight for neighbour lane l-1
    b_lane = jnp.where(even, b0, b1)

    x = x_ref[...]                               # (block_rows, 128), one load
    x_next = pltpu.roll(x, _LANES - 1, 1)        # lane l <- x[lane l+1]
    x_prev = pltpu.roll(x, 1, 1)                 # lane l <- x[lane l-1]

    y = w_self * x + w_next * x_next + w_prev * x_prev + b_lane
    o_ref[...] = y.astype(o_ref.dtype)           # single full-block store


@partial(jax.jit, static_argnames=("block_rows",))
def model_forward(x, weight, bias, *, block_rows=4096):
    """Equivalent of Model.forward(x1): F.linear(x1, weight, bias) over the
    last axis (in/out features == 2).

    # TODO(synk): the fresh ConvTranspose2d(2, 2, 2) branch in the PyTorch
    # forward is dead code (v1 is never used) and is intentionally omitted.
    """
    *lead, k = x.shape
    n, k_w = weight.shape
    assert k == 2 and k_w == 2 and n == 2, "Model is a Linear(2, 2)."

    # Keep the SMEM scalar path 32-bit regardless of parameter dtype.
    w32 = weight.astype(jnp.float32)
    b32 = bias.astype(jnp.float32)

    # Natural row-major flattening (zero data movement): features alternate
    # along the lane axis.  Pad the flat length up to a lane multiple if
    # needed (padding starts at an even flat index, so valid pairs never read
    # padded lanes through the rolls).
    t = math.prod(lead) * k
    rows = pl.cdiv(t, _LANES)
    t_pad = rows * _LANES
    x_flat = x.reshape(-1)
    if t_pad != t:
        x_flat = jnp.pad(x_flat, (0, t_pad - t))
    x2d = x_flat.reshape(rows, _LANES)

    # Tile rows: full-array block for tiny inputs, (8,128)-aligned otherwise.
    bs = min(block_rows, rows)
    if bs < rows:
        bs = max(8, (bs // 8) * 8)
    grid = (pl.cdiv(rows, bs),)

    out2d = pl.pallas_call(
        _linear2_kernel,
        out_shape=jax.ShapeDtypeStruct((rows, _LANES), x.dtype),
        grid=grid,
        in_specs=[
            pl.BlockSpec((bs, _LANES), lambda i: (i, 0)),        # x tile (VMEM)
            pl.BlockSpec(memory_space=pltpu.MemorySpace.SMEM),   # weight scalars
            pl.BlockSpec(memory_space=pltpu.MemorySpace.SMEM),   # bias scalars
        ],
        out_specs=pl.BlockSpec((bs, _LANES), lambda i: (i, 0)),
        compiler_params=pltpu.CompilerParams(
            dimension_semantics=("parallel",),
        ),
    )(x2d, w32, b32)

    # Output interleaving matches the natural (..., 2) layout -> free reshape.
    out_flat = out2d.reshape(-1)
    if t_pad != t:
        out_flat = out_flat[:t]
    return out_flat.reshape(*lead, n)


if __name__ == "__main__":
    key = jax.random.PRNGKey(0)
    kx, kw, kb = jax.random.split(key, 3)

    # Shapes consistent with the module: ConvTranspose2d(2, 2, 2) implies 2
    # input channels, Linear(2, 2) implies last dim 2.
    B, C, H, K = 2, 2, 32, 2
    N = 2

    x = jax.random.normal(kx, (B, C, H, K), dtype=jnp.float32)
    bound = 1.0 / math.sqrt(K)
    weight = jax.random.uniform(kw, (N, K), minval=-bound, maxval=bound,
                                dtype=jnp.float32)
    bias = jax.random.uniform(kb, (N,), minval=-bound, maxval=bound,
                              dtype=jnp.float32)

    out = jax.block_until_ready(model_forward(x, weight, bias))
    ref = x @ weight.T + bias
    assert out.shape == (B, C, H, N)
    assert jnp.allclose(out, ref, atol=1e-5, rtol=1e-5)

    # Second case: non-multiple-of-128 flat length (padding path) + multi-step
    # grid with a partial last block.
    x2 = jax.random.normal(kb, (2, 2, 136, K), dtype=jnp.float32)
    out2 = jax.block_until_ready(model_forward(x2, weight, bias, block_rows=8))
    ref2 = x2 @ weight.T + bias
    assert out2.shape == (2, 2, 136, N)
    assert jnp.allclose(out2, ref2, atol=1e-5, rtol=1e-5)

    print("KERNEL_OK")
</pallas_src>

<mosaic_0001>
module attributes {stable_mosaic.version = 11 : i64} {
  func.func @_linear2_kernel(%arg0: i32, %arg1: memref<2x128xf32, #tpu.memory_space<vmem>>, %arg2: memref<2x2xf32, #tpu.memory_space<smem>>, %arg3: memref<2xf32, #tpu.memory_space<smem>>, %arg4: memref<2x128xf32, #tpu.memory_space<vmem>>) attributes {dimension_semantics = [#tpu.dimension_semantics<parallel>], iteration_bounds = array<i64: 1>, scalar_prefetch = 0 : i64, scratch_operands = 0 : i64, tpu.core_type = #tpu.core_type<tc>, window_params = [{transform_indices = @transform_0, window_bounds = array<i64: 2, 128>}, {transform_indices = @transform_1, window_bounds = array<i64: 2, 2>}, {transform_indices = @transform_2, window_bounds = array<i64: 2>}, {transform_indices = @transform_3, window_bounds = array<i64: 2, 128>}]} {
    %0 = tpu.iota {dimensions = array<i32: 1>} : vector<1x128xi32>
    %c1_i32 = arith.constant 1 : i32
    %1 = vector.broadcast %c1_i32 : i32 to vector<1x128xi32>
    %2 = arith.andi %0, %1 : vector<1x128xi32>
    %c0_i32 = arith.constant 0 : i32
    %3 = vector.broadcast %c0_i32 : i32 to vector<1x128xi32>
    %4 = arith.cmpi eq, %2, %3 : vector<1x128xi32>
    %c0 = arith.constant 0 : index
    %c0_0 = arith.constant 0 : index
    %5 = memref.load %arg2[%c0, %c0_0] : memref<2x2xf32, #tpu.memory_space<smem>>
    %c0_1 = arith.constant 0 : index
    %c1 = arith.constant 1 : index
    %6 = memref.load %arg2[%c0_1, %c1] : memref<2x2xf32, #tpu.memory_space<smem>>
    %c1_2 = arith.constant 1 : index
    %c0_3 = arith.constant 0 : index
    %7 = memref.load %arg2[%c1_2, %c0_3] : memref<2x2xf32, #tpu.memory_space<smem>>
    %c1_4 = arith.constant 1 : index
    %c1_5 = arith.constant 1 : index
    %8 = memref.load %arg2[%c1_4, %c1_5] : memref<2x2xf32, #tpu.memory_space<smem>>
    %c0_6 = arith.constant 0 : index
    %9 = memref.load %arg3[%c0_6] : memref<2xf32, #tpu.memory_space<smem>>
    %c1_7 = arith.constant 1 : index
    %10 = memref.load %arg3[%c1_7] : memref<2xf32, #tpu.memory_space<smem>>
    %11 = vector.broadcast %5 : f32 to vector<1x128xf32>
    %12 = vector.broadcast %8 : f32 to vector<1x128xf32>
    %13 = arith.select %4, %11, %12 : vector<1x128xi1>, vector<1x128xf32>
    %cst = arith.constant 0.000000e+00 : f32
    %14 = vector.broadcast %6 : f32 to vector<1x128xf32>
    %15 = vector.broadcast %cst : f32 to vector<1x128xf32>
    %16 = arith.select %4, %14, %15 : vector<1x128xi1>, vector<1x128xf32>
    %cst_8 = arith.constant 0.000000e+00 : f32
    %17 = vector.broadcast %cst_8 : f32 to vector<1x128xf32>
    %18 = vector.broadcast %7 : f32 to vector<1x128xf32>
    %19 = arith.select %4, %17, %18 : vector<1x128xi1>, vector<1x128xf32>
    %20 = vector.broadcast %9 : f32 to vector<1x128xf32>
    %21 = vector.broadcast %10 : f32 to vector<1x128xf32>
    %22 = arith.select %4, %20, %21 : vector<1x128xi1>, vector<1x128xf32>
    %c0_9 = arith.constant 0 : index
    %c0_10 = arith.constant 0 : index
    %23 = vector.load %arg1[%c0_9, %c0_10] : memref<2x128xf32, #tpu.memory_space<vmem>>, vector<2x128xf32>
    %c127_i32 = arith.constant 127 : i32
    %24 = tpu.dynamic_rotate %23 by %c127_i32 dim 1 : vector<2x128xf32>, i32 -> vector<2x128xf32>
    %c1_i32_11 = arith.constant 1 : i32
    %25 = tpu.dynamic_rotate %23 by %c1_i32_11 dim 1 : vector<2x128xf32>, i32 -> vector<2x128xf32>
    %26 = vector.broadcast %13 : vector<1x128xf32> to vector<2x128xf32>
    %27 = arith.mulf %26, %23 : vector<2x128xf32>
    %28 = vector.broadcast %16 : vector<1x128xf32> to vector<2x128xf32>
    %29 = arith.mulf %28, %24 : vector<2x128xf32>
    %30 = arith.addf %27, %29 : vector<2x128xf32>
    %31 = vector.broadcast %19 : vector<1x128xf32> to vector<2x128xf32>
    %32 = arith.mulf %31, %25 : vector<2x128xf32>
    %33 = arith.addf %30, %32 : vector<2x128xf32>
    %34 = vector.broadcast %22 : vector<1x128xf32> to vector<2x128xf32>
    %35 = arith.addf %33, %34 : vector<2x128xf32>
    %c0_12 = arith.constant 0 : index
    %c0_13 = arith.constant 0 : index
    %36 = vector.load %arg4[%c0_12, %c0_13] : memref<2x128xf32, #tpu.memory_space<vmem>>, vector<2x128xf32>
    tpu.vector_store %arg4[%c0_12, %c0_13], %35 {strides = array<i32>} : memref<2x128xf32, #tpu.memory_space<vmem>>, vector<2x128xf32>,
    return
  }
  func.func @transform_0(%arg0: i32) -> (i32, i32) {
    %c0_i32 = arith.constant 0 : i32
    %c0_i32_0 = arith.constant 0 : i32
    return %arg0, %c0_i32 : i32, i32
  }
  func.func @transform_1(%arg0: i32) -> (i32, i32) {
    %c0_i32 = arith.constant 0 : i32
    %c0_i32_0 = arith.constant 0 : i32
    %c0_i32_1 = arith.constant 0 : i32
    return %c0_i32, %c0_i32_0 : i32, i32
  }
  func.func @transform_2(%arg0: i32) -> i32 {
    %c0_i32 = arith.constant 0 : i32
    %c0_i32_0 = arith.constant 0 : i32
    return %c0_i32 : i32
  }
  func.func @transform_3(%arg0: i32) -> (i32, i32) {
    %c0_i32 = arith.constant 0 : i32
    %c0_i32_0 = arith.constant 0 : i32
    return %arg0, %c0_i32 : i32, i32
  }
}

</mosaic_0001>

<bundles_post_ra>
// kernel: model_forward.1
= control target key start
LH: loop header
LB: loop body
LE: loop exit
PB: predicated region body
PF: predicated region fallthrough
CT: control target
= control target key end

     0   :  { %8 = vsyncpa [#allocation3], 0  ;;  %s161_s0 = inlined_call_operand.vmem [shape: f32[2,128], index: 0, kind: input, shape index: {}]   ;;  %s162_s1 = inlined_call_operand.vmem [shape: f32[2,2], index: 1, kind: input, shape index: {}]   ;;  %s163_s2 = inlined_call_operand.vmem [shape: f32[2], index: 2, kind: input, shape index: {}]   ;;  %s164_s3 = inlined_call_operand.vmem [shape: f32[2,128], index: 3, kind: output, shape index: {}]  }
   0x1   :  { %s18_s14 = sshll.u32 %s162_s1, 4  ;;  %s19_s14 = int_to_ptr.vmem [resolvable:$true] %s18_s14 }
   0x2   :  { %9 = vsyncpa [#allocation5], 0  ;;  %s28_s17 = sshll.u32 %s163_s2, 4  ;;  %s85_s18 = scalar_lea.vmem %s19_s14, 32  ;;  %s29_s17 = int_to_ptr.vmem [resolvable:$true] %s28_s17 }
   0x3   :  { %p86_p0 = scmp.ne.s32.totalorder %s19_s14, %s85_s18  ;;  %p90_p1 = scmp.lt.s32.totalorder %s19_s14, %s19_s14 }
   0x4   :  { %p91_p2 = scmp.lt.s32.totalorder %s85_s18, %s85_s18 }
   0x6   :  { %p92_p3 = por %p91_p2, %p90_p1 }
   0x8   :  { %p93_p4 = pnand %p92_p3, %p86_p0 }
   0xa   :  { %96 = shalt.err (!%p93_p4)
}
   0xb   :  { %s113_s19 = smov [#allocation2]   ;;  %s97_s20 = scalar_lea.vmem %s29_s17, 16 }
   0xc   :  { %21 = dma.vmem_to_smem %s19_s14, 32, %s113_s19, [#allocation3]  }
   0xd   :  { %p98_p5 = scmp.ne.s32.totalorder %s29_s17, %s97_s20  ;;  %p102_p6 = scmp.lt.s32.totalorder %s29_s17, %s29_s17 }
   0xe   :  { %p103_p7 = scmp.lt.s32.totalorder %s97_s20, %s97_s20 }
  0x10   :  { %p104_p8 = por %p103_p7, %p102_p6 }
  0x12   :  { %p105_p9 = pnand %p104_p8, %p98_p5 }
  0x14   :  { %108 = shalt.err (!%p105_p9)
}
  0x15   :  { %s114_s1 = smov [#allocation4]  }
  0x16   :  { %31 = dma.vmem_to_smem %s29_s17, 16, %s114_s1, [#allocation5]  }
  0x17   :  { %109 = dma.done.wait [#allocation3], 32  }
  0x18   :  { %110 = vsyncadd [#allocation3], 4294967264 }
  0x19   :  { %111 = dma.done.wait [#allocation5], 16  }
  0x1a   :  { %112 = vsyncadd [#allocation5], 4294967280 }
  0x1b   :  { %38 = sfence }
  0x1c   :  { %v59_v0 = vld [vmem:[%s161_s0] sm:$0x3]  ;;  %s115_s22 = smov 127   ;;  %s116_s23 = smov 1   ;;  %v39_v1 = vlaneseq }
  0x1d   :  { %60 = vrot.lane.b32.xlu0 %v59_v0, %s115_s22  ;;  %s43_s24 = sld [smem:[#allocation2]] }
  0x1e   :  { %s79_s25 = sld [smem:[#allocation2 + $0x81]]  ;;  %v40_v2 = vand.u32 127, %v39_v1 }
  0x1f   :  { %s77_s26 = sld [smem:[#allocation2 + $0x1]] }
  0x20   :  { %v41_v3 = vand.u32 1, %v40_v2  ;;  %s78_s27 = sld [smem:[#allocation2 + $0x80]] }
  0x21   :  { %62 = vrot.lane.b32.xlu0 %v59_v0, %s116_s23  ;;  %s47_s28 = sld [smem:[#allocation4]] }
  0x22   :  { %vm146_vm0 = vcmp.eq.s32.totalorder %v41_v3, 0  ;;  %s80_s0 = sld [smem:[#allocation4 + $0x1]] }
  0x23   :  { %v49_v5 = vstv %s43_s24 }
  0x24   :  { %v50_v6 = vstv %s79_s25 }
  0x25   :  { %v52_v7 = vstv %s77_s26  ;;  %v51_v8 = vsel %vm146_vm0, %v49_v5, %v50_v6 }
  0x26   :  { %v53_v9 = vsel %vm146_vm0, %v52_v7, 0.0  ;;  %v54_v10 = vstv %s78_s27  ;;  %v64_v12 = vmul.f32 %v59_v0, %v51_v8 }
  0x27   :  { %v55_v14 = vsel %vm146_vm0, 0.0, %v54_v10  ;;  %v56_v15 = vstv %s47_s28 }
  0x28   :  { %v57_v16 = vstv %s80_s0 }
  0x29   :  { %v58_v20 = vsel %vm146_vm0, %v56_v15, %v57_v16 }
  0x8f   :  { %v61_v11 = vpop.permute.xlu0 %60 }
  0x90   :  { %v65_v13 = vmul.f32 %v61_v11, %v53_v9 }
  0x92   :  { %v66_v18 = vadd.f32 %v65_v13, %v64_v12 }
  0x93   :  { %v63_v17 = vpop.permute.xlu0 %62 }
  0x94   :  { %v67_v19 = vmul.f32 %v63_v17, %v55_v14 }
  0x96   :  { %v68_v21 = vadd.f32 %v67_v19, %v66_v18 }
  0x98   :  { %v69_v22 = vadd.f32 %v68_v21, %v58_v20 }
  0x9a   :  { %70 = vst [vmem:[%s164_s3] sm:$0x3] %v69_v22 }
  0x9b   :  { %75 = vsyncpa [#allocation3], 1 }
  0x9c   :  { %76 = vsyncpa [#allocation5], 1 }

</bundles_post_ra>
